<compile_context>
chip_gen: v7x
topology: tpu7x:2x2x1
jax: 0.10.0
libtpu: 0.0.40
codegen_flags: <defaults>
</compile_context>

<pallas_src>
import numpy as np

import jax
import jax.numpy as jnp
from jax import lax
from jax.experimental import pallas as pl
from jax.experimental.pallas import tpu as pltpu

HIDDEN = 50
LANES = 128
SUBLANES = 8


def _round_up(x: int, m: int) -> int:
    return ((x + m - 1) // m) * m


def _make_kernel(pos_sign, strip, n_strips):
    """Kernel factory. pos_sign: static tuple of bools = (w2_j >= 0)."""
    n_hidden = len(pos_sign)

    def kernel(z_ref, a_ref, c_ref, b2_ref, out_ref):
        # Hoist the loop-invariant SMEM scalar loads out of the strip loop.
        a = [a_ref[j] for j in range(n_hidden)]
        c = [c_ref[j] for j in range(n_hidden)]
        b2 = b2_ref[0]

        def term(z, j):
            v = z * a[j] + c[j]
            # Static (trace-time) sign split: max for w2_j >= 0, min for < 0.
            return jnp.maximum(v, 0.0) if pos_sign[j] else jnp.minimum(v, 0.0)

        def strip_body(r, carry):
            r0 = pl.multiple_of(r * strip, strip)
            z = z_ref[pl.ds(r0, strip), :]
            # Two interleaved accumulators break the serial add chain; both
            # start from a hidden-unit term (no zeros/bias full-tile init).
            acc0 = term(z, 0)
            acc1 = term(z, 1)
            for j in range(2, n_hidden):
                if j % 2 == 0:
                    acc0 = acc0 + term(z, j)
                else:
                    acc1 = acc1 + term(z, j)
            out_ref[pl.ds(r0, strip), :] = acc0 + (acc1 + b2)
            return carry

        lax.fori_loop(0, n_strips, strip_body, 0)

    return kernel


def make_odefunc(w1, b1, w2, b2, *, max_tile_rows=2048):
    """Fold weights once and return a jitted forward(t, z) == ODEFunc.forward.

    Weight layout is transposed vs. PyTorch: w1 [1,50], b1 [1,50], w2 [50,1],
    b2 [1,1]; z is [batch, 1].  Weights must be concrete here (sign split).
    """
    w1f = np.asarray(jax.device_get(w1), np.float32).reshape(-1)
    b1f = np.asarray(jax.device_get(b1), np.float32).reshape(-1)
    w2f = np.asarray(jax.device_get(w2), np.float32).reshape(-1)
    b2f = np.asarray(jax.device_get(b2), np.float32).reshape(-1)
    assert w1f.shape == b1f.shape == w2f.shape and b2f.shape == (1,)

    a_arr = jnp.asarray(w1f * w2f)                    # a_j = w2_j * w1_j
    c_arr = jnp.asarray(b1f * w2f)                    # c_j = w2_j * b1_j
    b2_arr = jnp.asarray(b2f)                         # (1,)
    pos_sign = tuple(bool(s) for s in (w2f >= 0.0))   # static python bools

    def forward(t, z):
        del t  # unused; matches the reference module's signature
        batch = z.shape[0]

        # Lane-dense batch layout: [batch, 1] -> padded [rows, 128].
        rows = _round_up(max(batch, 1), LANES) // LANES
        rows = _round_up(rows, SUBLANES)
        if rows <= SUBLANES:
            tile_rows = rows                          # single tiny tile
        else:
            # >= 2 grid tiles so both v7x TensorCores get work; cap tile size.
            tile_rows = min(max_tile_rows, _round_up((rows + 1) // 2, SUBLANES))
            rows = _round_up(rows, tile_rows)
        padded = rows * LANES

        # Row strip that stays vreg-resident inside the kernel's fori_loop.
        if tile_rows % 32 == 0:
            strip = 32
        elif tile_rows % 16 == 0:
            strip = 16
        else:
            strip = 8
        n_strips = tile_rows // strip

        z_flat = z.reshape(-1).astype(jnp.float32)
        z2d = jnp.pad(z_flat, (0, padded - batch)).reshape(rows, LANES)

        grid = (rows // tile_rows,)
        out2d = pl.pallas_call(
            _make_kernel(pos_sign, strip, n_strips),
            out_shape=jax.ShapeDtypeStruct((rows, LANES), jnp.float32),
            grid=grid,
            in_specs=[
                pl.BlockSpec((tile_rows, LANES), lambda i: (i, 0)),  # z (VMEM)
                pl.BlockSpec(memory_space=pltpu.SMEM),               # a_j
                pl.BlockSpec(memory_space=pltpu.SMEM),               # c_j
                pl.BlockSpec(memory_space=pltpu.SMEM),               # b2
            ],
            out_specs=pl.BlockSpec((tile_rows, LANES), lambda i: (i, 0)),
            compiler_params=pltpu.CompilerParams(
                dimension_semantics=("parallel",)),                  # 2 TCs on v7x
        )(z2d, a_arr, c_arr, b2_arr)

        # Padded rows/lanes hold garbage (relu/min of bias terms); slice off.
        return out2d.reshape(-1)[:batch].reshape(batch, 1)

    # jit so the pad/reshape/slice fuse with neighbors instead of being
    # separate HBM round trips per call.
    return jax.jit(forward)


def init_params(key):
    """Deterministic parameter init mirroring nn.Linear shapes (transposed)."""
    k1, k2, k3, k4 = jax.random.split(key, 4)
    w1 = jax.random.uniform(k1, (1, HIDDEN), jnp.float32, -1.0, 1.0)  # fan_in = 1
    b1 = jax.random.uniform(k2, (1, HIDDEN), jnp.float32, -1.0, 1.0)
    bound2 = 1.0 / jnp.sqrt(50.0)
    w2 = jax.random.uniform(k3, (HIDDEN, 1), jnp.float32, -bound2, bound2)
    b2 = jax.random.uniform(k4, (1, 1), jnp.float32, -bound2, bound2)
    return w1, b1, w2, b2


if __name__ == "__main__":
    key = jax.random.PRNGKey(0)
    pkey, zkey1, zkey2, zkey3 = jax.random.split(key, 4)
    w1, b1, w2, b2 = init_params(pkey)
    forward = make_odefunc(w1, b1, w2, b2)
    t = jnp.zeros((), jnp.float32)  # unused, present for signature parity

    ok = True
    for zkey, batch in ((zkey1, 8), (zkey2, 500), (zkey3, 4096)):
        z = jax.random.normal(zkey, (batch, 1), jnp.float32)
        out = jax.block_until_ready(forward(t, z))

        # Reference in plain JAX (same math as the PyTorch module).
        ref = jnp.maximum(z @ w1 + b1, 0.0) @ w2 + b2
        ok &= bool(out.shape == (batch, 1))
        ok &= bool(jnp.allclose(out, ref, atol=1e-5, rtol=1e-5))

    assert ok
    print("KERNEL_OK")
</pallas_src>

<mosaic_0001>
module attributes {stable_mosaic.version = 11 : i64} {
  func.func @kernel(%arg0: i32, %arg1: memref<8x128xf32, #tpu.memory_space<vmem>>, %arg2: memref<50xf32, #tpu.memory_space<smem>>, %arg3: memref<50xf32, #tpu.memory_space<smem>>, %arg4: memref<1xf32, #tpu.memory_space<smem>>, %arg5: memref<8x128xf32, #tpu.memory_space<vmem>>) attributes {dimension_semantics = [#tpu.dimension_semantics<parallel>], iteration_bounds = array<i64: 1>, scalar_prefetch = 0 : i64, scratch_operands = 0 : i64, tpu.core_type = #tpu.core_type<tc>, window_params = [{transform_indices = @transform_0, window_bounds = array<i64: 8, 128>}, {transform_indices = @transform_1, window_bounds = array<i64: 50>}, {transform_indices = @transform_2, window_bounds = array<i64: 50>}, {transform_indices = @transform_3, window_bounds = array<i64: 1>}, {transform_indices = @transform_4, window_bounds = array<i64: 8, 128>}]} {
    %c0 = arith.constant 0 : index
    %0 = memref.load %arg2[%c0] : memref<50xf32, #tpu.memory_space<smem>>
    %c1 = arith.constant 1 : index
    %1 = memref.load %arg2[%c1] : memref<50xf32, #tpu.memory_space<smem>>
    %c2 = arith.constant 2 : index
    %2 = memref.load %arg2[%c2] : memref<50xf32, #tpu.memory_space<smem>>
    %c3 = arith.constant 3 : index
    %3 = memref.load %arg2[%c3] : memref<50xf32, #tpu.memory_space<smem>>
    %c4 = arith.constant 4 : index
    %4 = memref.load %arg2[%c4] : memref<50xf32, #tpu.memory_space<smem>>
    %c5 = arith.constant 5 : index
    %5 = memref.load %arg2[%c5] : memref<50xf32, #tpu.memory_space<smem>>
    %c6 = arith.constant 6 : index
    %6 = memref.load %arg2[%c6] : memref<50xf32, #tpu.memory_space<smem>>
    %c7 = arith.constant 7 : index
    %7 = memref.load %arg2[%c7] : memref<50xf32, #tpu.memory_space<smem>>
    %c8 = arith.constant 8 : index
    %8 = memref.load %arg2[%c8] : memref<50xf32, #tpu.memory_space<smem>>
    %c9 = arith.constant 9 : index
    %9 = memref.load %arg2[%c9] : memref<50xf32, #tpu.memory_space<smem>>
    %c10 = arith.constant 10 : index
    %10 = memref.load %arg2[%c10] : memref<50xf32, #tpu.memory_space<smem>>
    %c11 = arith.constant 11 : index
    %11 = memref.load %arg2[%c11] : memref<50xf32, #tpu.memory_space<smem>>
    %c12 = arith.constant 12 : index
    %12 = memref.load %arg2[%c12] : memref<50xf32, #tpu.memory_space<smem>>
    %c13 = arith.constant 13 : index
    %13 = memref.load %arg2[%c13] : memref<50xf32, #tpu.memory_space<smem>>
    %c14 = arith.constant 14 : index
    %14 = memref.load %arg2[%c14] : memref<50xf32, #tpu.memory_space<smem>>
    %c15 = arith.constant 15 : index
    %15 = memref.load %arg2[%c15] : memref<50xf32, #tpu.memory_space<smem>>
    %c16 = arith.constant 16 : index
    %16 = memref.load %arg2[%c16] : memref<50xf32, #tpu.memory_space<smem>>
    %c17 = arith.constant 17 : index
    %17 = memref.load %arg2[%c17] : memref<50xf32, #tpu.memory_space<smem>>
    %c18 = arith.constant 18 : index
    %18 = memref.load %arg2[%c18] : memref<50xf32, #tpu.memory_space<smem>>
    %c19 = arith.constant 19 : index
    %19 = memref.load %arg2[%c19] : memref<50xf32, #tpu.memory_space<smem>>
    %c20 = arith.constant 20 : index
    %20 = memref.load %arg2[%c20] : memref<50xf32, #tpu.memory_space<smem>>
    %c21 = arith.constant 21 : index
    %21 = memref.load %arg2[%c21] : memref<50xf32, #tpu.memory_space<smem>>
    %c22 = arith.constant 22 : index
    %22 = memref.load %arg2[%c22] : memref<50xf32, #tpu.memory_space<smem>>
    %c23 = arith.constant 23 : index
    %23 = memref.load %arg2[%c23] : memref<50xf32, #tpu.memory_space<smem>>
    %c24 = arith.constant 24 : index
    %24 = memref.load %arg2[%c24] : memref<50xf32, #tpu.memory_space<smem>>
    %c25 = arith.constant 25 : index
    %25 = memref.load %arg2[%c25] : memref<50xf32, #tpu.memory_space<smem>>
    %c26 = arith.constant 26 : index
    %26 = memref.load %arg2[%c26] : memref<50xf32, #tpu.memory_space<smem>>
    %c27 = arith.constant 27 : index
    %27 = memref.load %arg2[%c27] : memref<50xf32, #tpu.memory_space<smem>>
    %c28 = arith.constant 28 : index
    %28 = memref.load %arg2[%c28] : memref<50xf32, #tpu.memory_space<smem>>
    %c29 = arith.constant 29 : index
    %29 = memref.load %arg2[%c29] : memref<50xf32, #tpu.memory_space<smem>>
    %c30 = arith.constant 30 : index
    %30 = memref.load %arg2[%c30] : memref<50xf32, #tpu.memory_space<smem>>
    %c31 = arith.constant 31 : index
    %31 = memref.load %arg2[%c31] : memref<50xf32, #tpu.memory_space<smem>>
    %c32 = arith.constant 32 : index
    %32 = memref.load %arg2[%c32] : memref<50xf32, #tpu.memory_space<smem>>
    %c33 = arith.constant 33 : index
    %33 = memref.load %arg2[%c33] : memref<50xf32, #tpu.memory_space<smem>>
    %c34 = arith.constant 34 : index
    %34 = memref.load %arg2[%c34] : memref<50xf32, #tpu.memory_space<smem>>
    %c35 = arith.constant 35 : index
    %35 = memref.load %arg2[%c35] : memref<50xf32, #tpu.memory_space<smem>>
    %c36 = arith.constant 36 : index
    %36 = memref.load %arg2[%c36] : memref<50xf32, #tpu.memory_space<smem>>
    %c37 = arith.constant 37 : index
    %37 = memref.load %arg2[%c37] : memref<50xf32, #tpu.memory_space<smem>>
    %c38 = arith.constant 38 : index
    %38 = memref.load %arg2[%c38] : memref<50xf32, #tpu.memory_space<smem>>
    %c39 = arith.constant 39 : index
    %39 = memref.load %arg2[%c39] : memref<50xf32, #tpu.memory_space<smem>>
    %c40 = arith.constant 40 : index
    %40 = memref.load %arg2[%c40] : memref<50xf32, #tpu.memory_space<smem>>
    %c41 = arith.constant 41 : index
    %41 = memref.load %arg2[%c41] : memref<50xf32, #tpu.memory_space<smem>>
    %c42 = arith.constant 42 : index
    %42 = memref.load %arg2[%c42] : memref<50xf32, #tpu.memory_space<smem>>
    %c43 = arith.constant 43 : index
    %43 = memref.load %arg2[%c43] : memref<50xf32, #tpu.memory_space<smem>>
    %c44 = arith.constant 44 : index
    %44 = memref.load %arg2[%c44] : memref<50xf32, #tpu.memory_space<smem>>
    %c45 = arith.constant 45 : index
    %45 = memref.load %arg2[%c45] : memref<50xf32, #tpu.memory_space<smem>>
    %c46 = arith.constant 46 : index
    %46 = memref.load %arg2[%c46] : memref<50xf32, #tpu.memory_space<smem>>
    %c47 = arith.constant 47 : index
    %47 = memref.load %arg2[%c47] : memref<50xf32, #tpu.memory_space<smem>>
    %c48 = arith.constant 48 : index
    %48 = memref.load %arg2[%c48] : memref<50xf32, #tpu.memory_space<smem>>
    %c49 = arith.constant 49 : index
    %49 = memref.load %arg2[%c49] : memref<50xf32, #tpu.memory_space<smem>>
    %c0_0 = arith.constant 0 : index
    %50 = memref.load %arg3[%c0_0] : memref<50xf32, #tpu.memory_space<smem>>
    %c1_1 = arith.constant 1 : index
    %51 = memref.load %arg3[%c1_1] : memref<50xf32, #tpu.memory_space<smem>>
    %c2_2 = arith.constant 2 : index
    %52 = memref.load %arg3[%c2_2] : memref<50xf32, #tpu.memory_space<smem>>
    %c3_3 = arith.constant 3 : index
    %53 = memref.load %arg3[%c3_3] : memref<50xf32, #tpu.memory_space<smem>>
    %c4_4 = arith.constant 4 : index
    %54 = memref.load %arg3[%c4_4] : memref<50xf32, #tpu.memory_space<smem>>
    %c5_5 = arith.constant 5 : index
    %55 = memref.load %arg3[%c5_5] : memref<50xf32, #tpu.memory_space<smem>>
    %c6_6 = arith.constant 6 : index
    %56 = memref.load %arg3[%c6_6] : memref<50xf32, #tpu.memory_space<smem>>
    %c7_7 = arith.constant 7 : index
    %57 = memref.load %arg3[%c7_7] : memref<50xf32, #tpu.memory_space<smem>>
    %c8_8 = arith.constant 8 : index
    %58 = memref.load %arg3[%c8_8] : memref<50xf32, #tpu.memory_space<smem>>
    %c9_9 = arith.constant 9 : index
    %59 = memref.load %arg3[%c9_9] : memref<50xf32, #tpu.memory_space<smem>>
    %c10_10 = arith.constant 10 : index
    %60 = memref.load %arg3[%c10_10] : memref<50xf32, #tpu.memory_space<smem>>
    %c11_11 = arith.constant 11 : index
    %61 = memref.load %arg3[%c11_11] : memref<50xf32, #tpu.memory_space<smem>>
    %c12_12 = arith.constant 12 : index
    %62 = memref.load %arg3[%c12_12] : memref<50xf32, #tpu.memory_space<smem>>
    %c13_13 = arith.constant 13 : index
    %63 = memref.load %arg3[%c13_13] : memref<50xf32, #tpu.memory_space<smem>>
    %c14_14 = arith.constant 14 : index
    %64 = memref.load %arg3[%c14_14] : memref<50xf32, #tpu.memory_space<smem>>
    %c15_15 = arith.constant 15 : index
    %65 = memref.load %arg3[%c15_15] : memref<50xf32, #tpu.memory_space<smem>>
    %c16_16 = arith.constant 16 : index
    %66 = memref.load %arg3[%c16_16] : memref<50xf32, #tpu.memory_space<smem>>
    %c17_17 = arith.constant 17 : index
    %67 = memref.load %arg3[%c17_17] : memref<50xf32, #tpu.memory_space<smem>>
    %c18_18 = arith.constant 18 : index
    %68 = memref.load %arg3[%c18_18] : memref<50xf32, #tpu.memory_space<smem>>
    %c19_19 = arith.constant 19 : index
    %69 = memref.load %arg3[%c19_19] : memref<50xf32, #tpu.memory_space<smem>>
    %c20_20 = arith.constant 20 : index
    %70 = memref.load %arg3[%c20_20] : memref<50xf32, #tpu.memory_space<smem>>
    %c21_21 = arith.constant 21 : index
    %71 = memref.load %arg3[%c21_21] : memref<50xf32, #tpu.memory_space<smem>>
    %c22_22 = arith.constant 22 : index
    %72 = memref.load %arg3[%c22_22] : memref<50xf32, #tpu.memory_space<smem>>
    %c23_23 = arith.constant 23 : index
    %73 = memref.load %arg3[%c23_23] : memref<50xf32, #tpu.memory_space<smem>>
    %c24_24 = arith.constant 24 : index
    %74 = memref.load %arg3[%c24_24] : memref<50xf32, #tpu.memory_space<smem>>
    %c25_25 = arith.constant 25 : index
    %75 = memref.load %arg3[%c25_25] : memref<50xf32, #tpu.memory_space<smem>>
    %c26_26 = arith.constant 26 : index
    %76 = memref.load %arg3[%c26_26] : memref<50xf32, #tpu.memory_space<smem>>
    %c27_27 = arith.constant 27 : index
    %77 = memref.load %arg3[%c27_27] : memref<50xf32, #tpu.memory_space<smem>>
    %c28_28 = arith.constant 28 : index
    %78 = memref.load %arg3[%c28_28] : memref<50xf32, #tpu.memory_space<smem>>
    %c29_29 = arith.constant 29 : index
    %79 = memref.load %arg3[%c29_29] : memref<50xf32, #tpu.memory_space<smem>>
    %c30_30 = arith.constant 30 : index
    %80 = memref.load %arg3[%c30_30] : memref<50xf32, #tpu.memory_space<smem>>
    %c31_31 = arith.constant 31 : index
    %81 = memref.load %arg3[%c31_31] : memref<50xf32, #tpu.memory_space<smem>>
    %c32_32 = arith.constant 32 : index
    %82 = memref.load %arg3[%c32_32] : memref<50xf32, #tpu.memory_space<smem>>
    %c33_33 = arith.constant 33 : index
    %83 = memref.load %arg3[%c33_33] : memref<50xf32, #tpu.memory_space<smem>>
    %c34_34 = arith.constant 34 : index
    %84 = memref.load %arg3[%c34_34] : memref<50xf32, #tpu.memory_space<smem>>
    %c35_35 = arith.constant 35 : index
    %85 = memref.load %arg3[%c35_35] : memref<50xf32, #tpu.memory_space<smem>>
    %c36_36 = arith.constant 36 : index
    %86 = memref.load %arg3[%c36_36] : memref<50xf32, #tpu.memory_space<smem>>
    %c37_37 = arith.constant 37 : index
    %87 = memref.load %arg3[%c37_37] : memref<50xf32, #tpu.memory_space<smem>>
    %c38_38 = arith.constant 38 : index
    %88 = memref.load %arg3[%c38_38] : memref<50xf32, #tpu.memory_space<smem>>
    %c39_39 = arith.constant 39 : index
    %89 = memref.load %arg3[%c39_39] : memref<50xf32, #tpu.memory_space<smem>>
    %c40_40 = arith.constant 40 : index
    %90 = memref.load %arg3[%c40_40] : memref<50xf32, #tpu.memory_space<smem>>
    %c41_41 = arith.constant 41 : index
    %91 = memref.load %arg3[%c41_41] : memref<50xf32, #tpu.memory_space<smem>>
    %c42_42 = arith.constant 42 : index
    %92 = memref.load %arg3[%c42_42] : memref<50xf32, #tpu.memory_space<smem>>
    %c43_43 = arith.constant 43 : index
    %93 = memref.load %arg3[%c43_43] : memref<50xf32, #tpu.memory_space<smem>>
    %c44_44 = arith.constant 44 : index
    %94 = memref.load %arg3[%c44_44] : memref<50xf32, #tpu.memory_space<smem>>
    %c45_45 = arith.constant 45 : index
    %95 = memref.load %arg3[%c45_45] : memref<50xf32, #tpu.memory_space<smem>>
    %c46_46 = arith.constant 46 : index
    %96 = memref.load %arg3[%c46_46] : memref<50xf32, #tpu.memory_space<smem>>
    %c47_47 = arith.constant 47 : index
    %97 = memref.load %arg3[%c47_47] : memref<50xf32, #tpu.memory_space<smem>>
    %c48_48 = arith.constant 48 : index
    %98 = memref.load %arg3[%c48_48] : memref<50xf32, #tpu.memory_space<smem>>
    %c49_49 = arith.constant 49 : index
    %99 = memref.load %arg3[%c49_49] : memref<50xf32, #tpu.memory_space<smem>>
    %c0_50 = arith.constant 0 : index
    %100 = memref.load %arg4[%c0_50] : memref<1xf32, #tpu.memory_space<smem>>
    %c0_i32 = arith.constant 0 : i32
    %c8_i32 = arith.constant 8 : i32
    %101 = arith.muli %c0_i32, %c8_i32 : i32
    %102 = tpu.assume_multiple %101, 8 : i32
    %103 = arith.index_cast %102 : i32 to index
    %c0_51 = arith.constant 0 : index
    %104 = vector.load %arg1[%103, %c0_51] : memref<8x128xf32, #tpu.memory_space<vmem>>, vector<8x128xf32>
    %105 = vector.broadcast %0 : f32 to vector<8x128xf32>
    %106 = arith.mulf %104, %105 : vector<8x128xf32>
    %107 = vector.broadcast %50 : f32 to vector<8x128xf32>
    %108 = arith.addf %106, %107 : vector<8x128xf32>
    %cst = arith.constant 0.000000e+00 : f32
    %109 = vector.broadcast %cst : f32 to vector<8x128xf32>
    %110 = arith.minimumf %108, %109 : vector<8x128xf32>
    %111 = vector.broadcast %1 : f32 to vector<8x128xf32>
    %112 = arith.mulf %104, %111 : vector<8x128xf32>
    %113 = vector.broadcast %51 : f32 to vector<8x128xf32>
    %114 = arith.addf %112, %113 : vector<8x128xf32>
    %cst_52 = arith.constant 0.000000e+00 : f32
    %115 = vector.broadcast %cst_52 : f32 to vector<8x128xf32>
    %116 = arith.maximumf %114, %115 : vector<8x128xf32>
    %117 = vector.broadcast %2 : f32 to vector<8x128xf32>
    %118 = arith.mulf %104, %117 : vector<8x128xf32>
    %119 = vector.broadcast %52 : f32 to vector<8x128xf32>
    %120 = arith.addf %118, %119 : vector<8x128xf32>
    %cst_53 = arith.constant 0.000000e+00 : f32
    %121 = vector.broadcast %cst_53 : f32 to vector<8x128xf32>
    %122 = arith.minimumf %120, %121 : vector<8x128xf32>
    %123 = arith.addf %110, %122 : vector<8x128xf32>
    %124 = vector.broadcast %3 : f32 to vector<8x128xf32>
    %125 = arith.mulf %104, %124 : vector<8x128xf32>
    %126 = vector.broadcast %53 : f32 to vector<8x128xf32>
    %127 = arith.addf %125, %126 : vector<8x128xf32>
    %cst_54 = arith.constant 0.000000e+00 : f32
    %128 = vector.broadcast %cst_54 : f32 to vector<8x128xf32>
    %129 = arith.minimumf %127, %128 : vector<8x128xf32>
    %130 = arith.addf %116, %129 : vector<8x128xf32>
    %131 = vector.broadcast %4 : f32 to vector<8x128xf32>
    %132 = arith.mulf %104, %131 : vector<8x128xf32>
    %133 = vector.broadcast %54 : f32 to vector<8x128xf32>
    %134 = arith.addf %132, %133 : vector<8x128xf32>
    %cst_55 = arith.constant 0.000000e+00 : f32
    %135 = vector.broadcast %cst_55 : f32 to vector<8x128xf32>
    %136 = arith.maximumf %134, %135 : vector<8x128xf32>
    %137 = arith.addf %123, %136 : vector<8x128xf32>
    %138 = vector.broadcast %5 : f32 to vector<8x128xf32>
    %139 = arith.mulf %104, %138 : vector<8x128xf32>
    %140 = vector.broadcast %55 : f32 to vector<8x128xf32>
    %141 = arith.addf %139, %140 : vector<8x128xf32>
    %cst_56 = arith.constant 0.000000e+00 : f32
    %142 = vector.broadcast %cst_56 : f32 to vector<8x128xf32>
    %143 = arith.maximumf %141, %142 : vector<8x128xf32>
    %144 = arith.addf %130, %143 : vector<8x128xf32>
    %145 = vector.broadcast %6 : f32 to vector<8x128xf32>
    %146 = arith.mulf %104, %145 : vector<8x128xf32>
    %147 = vector.broadcast %56 : f32 to vector<8x128xf32>
    %148 = arith.addf %146, %147 : vector<8x128xf32>
    %cst_57 = arith.constant 0.000000e+00 : f32
    %149 = vector.broadcast %cst_57 : f32 to vector<8x128xf32>
    %150 = arith.maximumf %148, %149 : vector<8x128xf32>
    %151 = arith.addf %137, %150 : vector<8x128xf32>
    %152 = vector.broadcast %7 : f32 to vector<8x128xf32>
    %153 = arith.mulf %104, %152 : vector<8x128xf32>
    %154 = vector.broadcast %57 : f32 to vector<8x128xf32>
    %155 = arith.addf %153, %154 : vector<8x128xf32>
    %cst_58 = arith.constant 0.000000e+00 : f32
    %156 = vector.broadcast %cst_58 : f32 to vector<8x128xf32>
    %157 = arith.maximumf %155, %156 : vector<8x128xf32>
    %158 = arith.addf %144, %157 : vector<8x128xf32>
    %159 = vector.broadcast %8 : f32 to vector<8x128xf32>
    %160 = arith.mulf %104, %159 : vector<8x128xf32>
    %161 = vector.broadcast %58 : f32 to vector<8x128xf32>
    %162 = arith.addf %160, %161 : vector<8x128xf32>
    %cst_59 = arith.constant 0.000000e+00 : f32
    %163 = vector.broadcast %cst_59 : f32 to vector<8x128xf32>
    %164 = arith.minimumf %162, %163 : vector<8x128xf32>
    %165 = arith.addf %151, %164 : vector<8x128xf32>
    %166 = vector.broadcast %9 : f32 to vector<8x128xf32>
    %167 = arith.mulf %104, %166 : vector<8x128xf32>
    %168 = vector.broadcast %59 : f32 to vector<8x128xf32>
    %169 = arith.addf %167, %168 : vector<8x128xf32>
    %cst_60 = arith.constant 0.000000e+00 : f32
    %170 = vector.broadcast %cst_60 : f32 to vector<8x128xf32>
    %171 = arith.maximumf %169, %170 : vector<8x128xf32>
    %172 = arith.addf %158, %171 : vector<8x128xf32>
    %173 = vector.broadcast %10 : f32 to vector<8x128xf32>
    %174 = arith.mulf %104, %173 : vector<8x128xf32>
    %175 = vector.broadcast %60 : f32 to vector<8x128xf32>
    %176 = arith.addf %174, %175 : vector<8x128xf32>
    %cst_61 = arith.constant 0.000000e+00 : f32
    %177 = vector.broadcast %cst_61 : f32 to vector<8x128xf32>
    %178 = arith.minimumf %176, %177 : vector<8x128xf32>
    %179 = arith.addf %165, %178 : vector<8x128xf32>
    %180 = vector.broadcast %11 : f32 to vector<8x128xf32>
    %181 = arith.mulf %104, %180 : vector<8x128xf32>
    %182 = vector.broadcast %61 : f32 to vector<8x128xf32>
    %183 = arith.addf %181, %182 : vector<8x128xf32>
    %cst_62 = arith.constant 0.000000e+00 : f32
    %184 = vector.broadcast %cst_62 : f32 to vector<8x128xf32>
    %185 = arith.maximumf %183, %184 : vector<8x128xf32>
    %186 = arith.addf %172, %185 : vector<8x128xf32>
    %187 = vector.broadcast %12 : f32 to vector<8x128xf32>
    %188 = arith.mulf %104, %187 : vector<8x128xf32>
    %189 = vector.broadcast %62 : f32 to vector<8x128xf32>
    %190 = arith.addf %188, %189 : vector<8x128xf32>
    %cst_63 = arith.constant 0.000000e+00 : f32
    %191 = vector.broadcast %cst_63 : f32 to vector<8x128xf32>
    %192 = arith.maximumf %190, %191 : vector<8x128xf32>
    %193 = arith.addf %179, %192 : vector<8x128xf32>
    %194 = vector.broadcast %13 : f32 to vector<8x128xf32>
    %195 = arith.mulf %104, %194 : vector<8x128xf32>
    %196 = vector.broadcast %63 : f32 to vector<8x128xf32>
    %197 = arith.addf %195, %196 : vector<8x128xf32>
    %cst_64 = arith.constant 0.000000e+00 : f32
    %198 = vector.broadcast %cst_64 : f32 to vector<8x128xf32>
    %199 = arith.maximumf %197, %198 : vector<8x128xf32>
    %200 = arith.addf %186, %199 : vector<8x128xf32>
    %201 = vector.broadcast %14 : f32 to vector<8x128xf32>
    %202 = arith.mulf %104, %201 : vector<8x128xf32>
    %203 = vector.broadcast %64 : f32 to vector<8x128xf32>
    %204 = arith.addf %202, %203 : vector<8x128xf32>
    %cst_65 = arith.constant 0.000000e+00 : f32
    %205 = vector.broadcast %cst_65 : f32 to vector<8x128xf32>
    %206 = arith.minimumf %204, %205 : vector<8x128xf32>
    %207 = arith.addf %193, %206 : vector<8x128xf32>
    %208 = vector.broadcast %15 : f32 to vector<8x128xf32>
    %209 = arith.mulf %104, %208 : vector<8x128xf32>
    %210 = vector.broadcast %65 : f32 to vector<8x128xf32>
    %211 = arith.addf %209, %210 : vector<8x128xf32>
    %cst_66 = arith.constant 0.000000e+00 : f32
    %212 = vector.broadcast %cst_66 : f32 to vector<8x128xf32>
    %213 = arith.maximumf %211, %212 : vector<8x128xf32>
    %214 = arith.addf %200, %213 : vector<8x128xf32>
    %215 = vector.broadcast %16 : f32 to vector<8x128xf32>
    %216 = arith.mulf %104, %215 : vector<8x128xf32>
    %217 = vector.broadcast %66 : f32 to vector<8x128xf32>
    %218 = arith.addf %216, %217 : vector<8x128xf32>
    %cst_67 = arith.constant 0.000000e+00 : f32
    %219 = vector.broadcast %cst_67 : f32 to vector<8x128xf32>
    %220 = arith.minimumf %218, %219 : vector<8x128xf32>
    %221 = arith.addf %207, %220 : vector<8x128xf32>
    %222 = vector.broadcast %17 : f32 to vector<8x128xf32>
    %223 = arith.mulf %104, %222 : vector<8x128xf32>
    %224 = vector.broadcast %67 : f32 to vector<8x128xf32>
    %225 = arith.addf %223, %224 : vector<8x128xf32>
    %cst_68 = arith.constant 0.000000e+00 : f32
    %226 = vector.broadcast %cst_68 : f32 to vector<8x128xf32>
    %227 = arith.maximumf %225, %226 : vector<8x128xf32>
    %228 = arith.addf %214, %227 : vector<8x128xf32>
    %229 = vector.broadcast %18 : f32 to vector<8x128xf32>
    %230 = arith.mulf %104, %229 : vector<8x128xf32>
    %231 = vector.broadcast %68 : f32 to vector<8x128xf32>
    %232 = arith.addf %230, %231 : vector<8x128xf32>
    %cst_69 = arith.constant 0.000000e+00 : f32
    %233 = vector.broadcast %cst_69 : f32 to vector<8x128xf32>
    %234 = arith.minimumf %232, %233 : vector<8x128xf32>
    %235 = arith.addf %221, %234 : vector<8x128xf32>
    %236 = vector.broadcast %19 : f32 to vector<8x128xf32>
    %237 = arith.mulf %104, %236 : vector<8x128xf32>
    %238 = vector.broadcast %69 : f32 to vector<8x128xf32>
    %239 = arith.addf %237, %238 : vector<8x128xf32>
    %cst_70 = arith.constant 0.000000e+00 : f32
    %240 = vector.broadcast %cst_70 : f32 to vector<8x128xf32>
    %241 = arith.minimumf %239, %240 : vector<8x128xf32>
    %242 = arith.addf %228, %241 : vector<8x128xf32>
    %243 = vector.broadcast %20 : f32 to vector<8x128xf32>
    %244 = arith.mulf %104, %243 : vector<8x128xf32>
    %245 = vector.broadcast %70 : f32 to vector<8x128xf32>
    %246 = arith.addf %244, %245 : vector<8x128xf32>
    %cst_71 = arith.constant 0.000000e+00 : f32
    %247 = vector.broadcast %cst_71 : f32 to vector<8x128xf32>
    %248 = arith.minimumf %246, %247 : vector<8x128xf32>
    %249 = arith.addf %235, %248 : vector<8x128xf32>
    %250 = vector.broadcast %21 : f32 to vector<8x128xf32>
    %251 = arith.mulf %104, %250 : vector<8x128xf32>
    %252 = vector.broadcast %71 : f32 to vector<8x128xf32>
    %253 = arith.addf %251, %252 : vector<8x128xf32>
    %cst_72 = arith.constant 0.000000e+00 : f32
    %254 = vector.broadcast %cst_72 : f32 to vector<8x128xf32>
    %255 = arith.maximumf %253, %254 : vector<8x128xf32>
    %256 = arith.addf %242, %255 : vector<8x128xf32>
    %257 = vector.broadcast %22 : f32 to vector<8x128xf32>
    %258 = arith.mulf %104, %257 : vector<8x128xf32>
    %259 = vector.broadcast %72 : f32 to vector<8x128xf32>
    %260 = arith.addf %258, %259 : vector<8x128xf32>
    %cst_73 = arith.constant 0.000000e+00 : f32
    %261 = vector.broadcast %cst_73 : f32 to vector<8x128xf32>
    %262 = arith.minimumf %260, %261 : vector<8x128xf32>
    %263 = arith.addf %249, %262 : vector<8x128xf32>
    %264 = vector.broadcast %23 : f32 to vector<8x128xf32>
    %265 = arith.mulf %104, %264 : vector<8x128xf32>
    %266 = vector.broadcast %73 : f32 to vector<8x128xf32>
    %267 = arith.addf %265, %266 : vector<8x128xf32>
    %cst_74 = arith.constant 0.000000e+00 : f32
    %268 = vector.broadcast %cst_74 : f32 to vector<8x128xf32>
    %269 = arith.maximumf %267, %268 : vector<8x128xf32>
    %270 = arith.addf %256, %269 : vector<8x128xf32>
    %271 = vector.broadcast %24 : f32 to vector<8x128xf32>
    %272 = arith.mulf %104, %271 : vector<8x128xf32>
    %273 = vector.broadcast %74 : f32 to vector<8x128xf32>
    %274 = arith.addf %272, %273 : vector<8x128xf32>
    %cst_75 = arith.constant 0.000000e+00 : f32
    %275 = vector.broadcast %cst_75 : f32 to vector<8x128xf32>
    %276 = arith.minimumf %274, %275 : vector<8x128xf32>
    %277 = arith.addf %263, %276 : vector<8x128xf32>
    %278 = vector.broadcast %25 : f32 to vector<8x128xf32>
    %279 = arith.mulf %104, %278 : vector<8x128xf32>
    %280 = vector.broadcast %75 : f32 to vector<8x128xf32>
    %281 = arith.addf %279, %280 : vector<8x128xf32>
    %cst_76 = arith.constant 0.000000e+00 : f32
    %282 = vector.broadcast %cst_76 : f32 to vector<8x128xf32>
    %283 = arith.maximumf %281, %282 : vector<8x128xf32>
    %284 = arith.addf %270, %283 : vector<8x128xf32>
    %285 = vector.broadcast %26 : f32 to vector<8x128xf32>
    %286 = arith.mulf %104, %285 : vector<8x128xf32>
    %287 = vector.broadcast %76 : f32 to vector<8x128xf32>
    %288 = arith.addf %286, %287 : vector<8x128xf32>
    %cst_77 = arith.constant 0.000000e+00 : f32
    %289 = vector.broadcast %cst_77 : f32 to vector<8x128xf32>
    %290 = arith.maximumf %288, %289 : vector<8x128xf32>
    %291 = arith.addf %277, %290 : vector<8x128xf32>
    %292 = vector.broadcast %27 : f32 to vector<8x128xf32>
    %293 = arith.mulf %104, %292 : vector<8x128xf32>
    %294 = vector.broadcast %77 : f32 to vector<8x128xf32>
    %295 = arith.addf %293, %294 : vector<8x128xf32>
    %cst_78 = arith.constant 0.000000e+00 : f32
    %296 = vector.broadcast %cst_78 : f32 to vector<8x128xf32>
    %297 = arith.maximumf %295, %296 : vector<8x128xf32>
    %298 = arith.addf %284, %297 : vector<8x128xf32>
    %299 = vector.broadcast %28 : f32 to vector<8x128xf32>
    %300 = arith.mulf %104, %299 : vector<8x128xf32>
    %301 = vector.broadcast %78 : f32 to vector<8x128xf32>
    %302 = arith.addf %300, %301 : vector<8x128xf32>
    %cst_79 = arith.constant 0.000000e+00 : f32
    %303 = vector.broadcast %cst_79 : f32 to vector<8x128xf32>
    %304 = arith.maximumf %302, %303 : vector<8x128xf32>
    %305 = arith.addf %291, %304 : vector<8x128xf32>
    %306 = vector.broadcast %29 : f32 to vector<8x128xf32>
    %307 = arith.mulf %104, %306 : vector<8x128xf32>
    %308 = vector.broadcast %79 : f32 to vector<8x128xf32>
    %309 = arith.addf %307, %308 : vector<8x128xf32>
    %cst_80 = arith.constant 0.000000e+00 : f32
    %310 = vector.broadcast %cst_80 : f32 to vector<8x128xf32>
    %311 = arith.minimumf %309, %310 : vector<8x128xf32>
    %312 = arith.addf %298, %311 : vector<8x128xf32>
    %313 = vector.broadcast %30 : f32 to vector<8x128xf32>
    %314 = arith.mulf %104, %313 : vector<8x128xf32>
    %315 = vector.broadcast %80 : f32 to vector<8x128xf32>
    %316 = arith.addf %314, %315 : vector<8x128xf32>
    %cst_81 = arith.constant 0.000000e+00 : f32
    %317 = vector.broadcast %cst_81 : f32 to vector<8x128xf32>
    %318 = arith.maximumf %316, %317 : vector<8x128xf32>
    %319 = arith.addf %305, %318 : vector<8x128xf32>
    %320 = vector.broadcast %31 : f32 to vector<8x128xf32>
    %321 = arith.mulf %104, %320 : vector<8x128xf32>
    %322 = vector.broadcast %81 : f32 to vector<8x128xf32>
    %323 = arith.addf %321, %322 : vector<8x128xf32>
    %cst_82 = arith.constant 0.000000e+00 : f32
    %324 = vector.broadcast %cst_82 : f32 to vector<8x128xf32>
    %325 = arith.minimumf %323, %324 : vector<8x128xf32>
    %326 = arith.addf %312, %325 : vector<8x128xf32>
    %327 = vector.broadcast %32 : f32 to vector<8x128xf32>
    %328 = arith.mulf %104, %327 : vector<8x128xf32>
    %329 = vector.broadcast %82 : f32 to vector<8x128xf32>
    %330 = arith.addf %328, %329 : vector<8x128xf32>
    %cst_83 = arith.constant 0.000000e+00 : f32
    %331 = vector.broadcast %cst_83 : f32 to vector<8x128xf32>
    %332 = arith.minimumf %330, %331 : vector<8x128xf32>
    %333 = arith.addf %319, %332 : vector<8x128xf32>
    %334 = vector.broadcast %33 : f32 to vector<8x128xf32>
    %335 = arith.mulf %104, %334 : vector<8x128xf32>
    %336 = vector.broadcast %83 : f32 to vector<8x128xf32>
    %337 = arith.addf %335, %336 : vector<8x128xf32>
    %cst_84 = arith.constant 0.000000e+00 : f32
    %338 = vector.broadcast %cst_84 : f32 to vector<8x128xf32>
    %339 = arith.minimumf %337, %338 : vector<8x128xf32>
    %340 = arith.addf %326, %339 : vector<8x128xf32>
    %341 = vector.broadcast %34 : f32 to vector<8x128xf32>
    %342 = arith.mulf %104, %341 : vector<8x128xf32>
    %343 = vector.broadcast %84 : f32 to vector<8x128xf32>
    %344 = arith.addf %342, %343 : vector<8x128xf32>
    %cst_85 = arith.constant 0.000000e+00 : f32
    %345 = vector.broadcast %cst_85 : f32 to vector<8x128xf32>
    %346 = arith.minimumf %344, %345 : vector<8x128xf32>
    %347 = arith.addf %333, %346 : vector<8x128xf32>
    %348 = vector.broadcast %35 : f32 to vector<8x128xf32>
    %349 = arith.mulf %104, %348 : vector<8x128xf32>
    %350 = vector.broadcast %85 : f32 to vector<8x128xf32>
    %351 = arith.addf %349, %350 : vector<8x128xf32>
    %cst_86 = arith.constant 0.000000e+00 : f32
    %352 = vector.broadcast %cst_86 : f32 to vector<8x128xf32>
    %353 = arith.minimumf %351, %352 : vector<8x128xf32>
    %354 = arith.addf %340, %353 : vector<8x128xf32>
    %355 = vector.broadcast %36 : f32 to vector<8x128xf32>
    %356 = arith.mulf %104, %355 : vector<8x128xf32>
    %357 = vector.broadcast %86 : f32 to vector<8x128xf32>
    %358 = arith.addf %356, %357 : vector<8x128xf32>
    %cst_87 = arith.constant 0.000000e+00 : f32
    %359 = vector.broadcast %cst_87 : f32 to vector<8x128xf32>
    %360 = arith.minimumf %358, %359 : vector<8x128xf32>
    %361 = arith.addf %347, %360 : vector<8x128xf32>
    %362 = vector.broadcast %37 : f32 to vector<8x128xf32>
    %363 = arith.mulf %104, %362 : vector<8x128xf32>
    %364 = vector.broadcast %87 : f32 to vector<8x128xf32>
    %365 = arith.addf %363, %364 : vector<8x128xf32>
    %cst_88 = arith.constant 0.000000e+00 : f32
    %366 = vector.broadcast %cst_88 : f32 to vector<8x128xf32>
    %367 = arith.maximumf %365, %366 : vector<8x128xf32>
    %368 = arith.addf %354, %367 : vector<8x128xf32>
    %369 = vector.broadcast %38 : f32 to vector<8x128xf32>
    %370 = arith.mulf %104, %369 : vector<8x128xf32>
    %371 = vector.broadcast %88 : f32 to vector<8x128xf32>
    %372 = arith.addf %370, %371 : vector<8x128xf32>
    %cst_89 = arith.constant 0.000000e+00 : f32
    %373 = vector.broadcast %cst_89 : f32 to vector<8x128xf32>
    %374 = arith.minimumf %372, %373 : vector<8x128xf32>
    %375 = arith.addf %361, %374 : vector<8x128xf32>
    %376 = vector.broadcast %39 : f32 to vector<8x128xf32>
    %377 = arith.mulf %104, %376 : vector<8x128xf32>
    %378 = vector.broadcast %89 : f32 to vector<8x128xf32>
    %379 = arith.addf %377, %378 : vector<8x128xf32>
    %cst_90 = arith.constant 0.000000e+00 : f32
    %380 = vector.broadcast %cst_90 : f32 to vector<8x128xf32>
    %381 = arith.maximumf %379, %380 : vector<8x128xf32>
    %382 = arith.addf %368, %381 : vector<8x128xf32>
    %383 = vector.broadcast %40 : f32 to vector<8x128xf32>
    %384 = arith.mulf %104, %383 : vector<8x128xf32>
    %385 = vector.broadcast %90 : f32 to vector<8x128xf32>
    %386 = arith.addf %384, %385 : vector<8x128xf32>
    %cst_91 = arith.constant 0.000000e+00 : f32
    %387 = vector.broadcast %cst_91 : f32 to vector<8x128xf32>
    %388 = arith.minimumf %386, %387 : vector<8x128xf32>
    %389 = arith.addf %375, %388 : vector<8x128xf32>
    %390 = vector.broadcast %41 : f32 to vector<8x128xf32>
    %391 = arith.mulf %104, %390 : vector<8x128xf32>
    %392 = vector.broadcast %91 : f32 to vector<8x128xf32>
    %393 = arith.addf %391, %392 : vector<8x128xf32>
    %cst_92 = arith.constant 0.000000e+00 : f32
    %394 = vector.broadcast %cst_92 : f32 to vector<8x128xf32>
    %395 = arith.minimumf %393, %394 : vector<8x128xf32>
    %396 = arith.addf %382, %395 : vector<8x128xf32>
    %397 = vector.broadcast %42 : f32 to vector<8x128xf32>
    %398 = arith.mulf %104, %397 : vector<8x128xf32>
    %399 = vector.broadcast %92 : f32 to vector<8x128xf32>
    %400 = arith.addf %398, %399 : vector<8x128xf32>
    %cst_93 = arith.constant 0.000000e+00 : f32
    %401 = vector.broadcast %cst_93 : f32 to vector<8x128xf32>
    %402 = arith.maximumf %400, %401 : vector<8x128xf32>
    %403 = arith.addf %389, %402 : vector<8x128xf32>
    %404 = vector.broadcast %43 : f32 to vector<8x128xf32>
    %405 = arith.mulf %104, %404 : vector<8x128xf32>
    %406 = vector.broadcast %93 : f32 to vector<8x128xf32>
    %407 = arith.addf %405, %406 : vector<8x128xf32>
    %cst_94 = arith.constant 0.000000e+00 : f32
    %408 = vector.broadcast %cst_94 : f32 to vector<8x128xf32>
    %409 = arith.maximumf %407, %408 : vector<8x128xf32>
    %410 = arith.addf %396, %409 : vector<8x128xf32>
    %411 = vector.broadcast %44 : f32 to vector<8x128xf32>
    %412 = arith.mulf %104, %411 : vector<8x128xf32>
    %413 = vector.broadcast %94 : f32 to vector<8x128xf32>
    %414 = arith.addf %412, %413 : vector<8x128xf32>
    %cst_95 = arith.constant 0.000000e+00 : f32
    %415 = vector.broadcast %cst_95 : f32 to vector<8x128xf32>
    %416 = arith.maximumf %414, %415 : vector<8x128xf32>
    %417 = arith.addf %403, %416 : vector<8x128xf32>
    %418 = vector.broadcast %45 : f32 to vector<8x128xf32>
    %419 = arith.mulf %104, %418 : vector<8x128xf32>
    %420 = vector.broadcast %95 : f32 to vector<8x128xf32>
    %421 = arith.addf %419, %420 : vector<8x128xf32>
    %cst_96 = arith.constant 0.000000e+00 : f32
    %422 = vector.broadcast %cst_96 : f32 to vector<8x128xf32>
    %423 = arith.minimumf %421, %422 : vector<8x128xf32>
    %424 = arith.addf %410, %423 : vector<8x128xf32>
    %425 = vector.broadcast %46 : f32 to vector<8x128xf32>
    %426 = arith.mulf %104, %425 : vector<8x128xf32>
    %427 = vector.broadcast %96 : f32 to vector<8x128xf32>
    %428 = arith.addf %426, %427 : vector<8x128xf32>
    %cst_97 = arith.constant 0.000000e+00 : f32
    %429 = vector.broadcast %cst_97 : f32 to vector<8x128xf32>
    %430 = arith.minimumf %428, %429 : vector<8x128xf32>
    %431 = arith.addf %417, %430 : vector<8x128xf32>
    %432 = vector.broadcast %47 : f32 to vector<8x128xf32>
    %433 = arith.mulf %104, %432 : vector<8x128xf32>
    %434 = vector.broadcast %97 : f32 to vector<8x128xf32>
    %435 = arith.addf %433, %434 : vector<8x128xf32>
    %cst_98 = arith.constant 0.000000e+00 : f32
    %436 = vector.broadcast %cst_98 : f32 to vector<8x128xf32>
    %437 = arith.minimumf %435, %436 : vector<8x128xf32>
    %438 = arith.addf %424, %437 : vector<8x128xf32>
    %439 = vector.broadcast %48 : f32 to vector<8x128xf32>
    %440 = arith.mulf %104, %439 : vector<8x128xf32>
    %441 = vector.broadcast %98 : f32 to vector<8x128xf32>
    %442 = arith.addf %440, %441 : vector<8x128xf32>
    %cst_99 = arith.constant 0.000000e+00 : f32
    %443 = vector.broadcast %cst_99 : f32 to vector<8x128xf32>
    %444 = arith.minimumf %442, %443 : vector<8x128xf32>
    %445 = arith.addf %431, %444 : vector<8x128xf32>
    %446 = vector.broadcast %49 : f32 to vector<8x128xf32>
    %447 = arith.mulf %104, %446 : vector<8x128xf32>
    %448 = vector.broadcast %99 : f32 to vector<8x128xf32>
    %449 = arith.addf %447, %448 : vector<8x128xf32>
    %cst_100 = arith.constant 0.000000e+00 : f32
    %450 = vector.broadcast %cst_100 : f32 to vector<8x128xf32>
    %451 = arith.minimumf %449, %450 : vector<8x128xf32>
    %452 = arith.addf %438, %451 : vector<8x128xf32>
    %453 = vector.broadcast %100 : f32 to vector<8x128xf32>
    %454 = arith.addf %452, %453 : vector<8x128xf32>
    %455 = arith.addf %445, %454 : vector<8x128xf32>
    %456 = arith.index_cast %102 : i32 to index
    %c0_101 = arith.constant 0 : index
    %457 = vector.load %arg5[%456, %c0_101] : memref<8x128xf32, #tpu.memory_space<vmem>>, vector<8x128xf32>
    tpu.vector_store %arg5[%456, %c0_101], %455 {strides = array<i32>} : memref<8x128xf32, #tpu.memory_space<vmem>>, vector<8x128xf32>,
    %c1_i32 = arith.constant 1 : i32
    return
  }
  func.func @transform_0(%arg0: i32) -> (i32, i32) {
    %c0_i32 = arith.constant 0 : i32
    %c0_i32_0 = arith.constant 0 : i32
    return %arg0, %c0_i32 : i32, i32
  }
  func.func @transform_1(%arg0: i32) -> i32 {
    %c0_i32 = arith.constant 0 : i32
    %c0_i32_0 = arith.constant 0 : i32
    return %c0_i32 : i32
  }
  func.func @transform_2(%arg0: i32) -> i32 {
    %c0_i32 = arith.constant 0 : i32
    %c0_i32_0 = arith.constant 0 : i32
    return %c0_i32 : i32
  }
  func.func @transform_3(%arg0: i32) -> i32 {
    %c0_i32 = arith.constant 0 : i32
    %c0_i32_0 = arith.constant 0 : i32
    return %c0_i32 : i32
  }
  func.func @transform_4(%arg0: i32) -> (i32, i32) {
    %c0_i32 = arith.constant 0 : i32
    %c0_i32_0 = arith.constant 0 : i32
    return %arg0, %c0_i32 : i32, i32
  }
}

</mosaic_0001>

<bundles_post_ra>
// kernel: forward.1
= control target key start
LH: loop header
LB: loop body
LE: loop exit
PB: predicated region body
PF: predicated region fallthrough
CT: control target
= control target key end

     0   :  { %10 = vsyncpa [#allocation4], 0  ;;  %s1107_s0 = inlined_call_operand.vmem [shape: f32[8,128], index: 0, kind: input, shape index: {}]   ;;  %s1108_s1 = inlined_call_operand.vmem [shape: f32[50], index: 1, kind: input, shape index: {}]   ;;  %s1109_s2 = inlined_call_operand.vmem [shape: f32[50], index: 2, kind: input, shape index: {}]   ;;  %s1110_s3 = inlined_call_operand.<no memory space> [shape: f32[1], index: 3, kind: input, shape index: {}]   ;;  %s1111_s4 = inlined_call_operand.vmem [shape: f32[8,128], index: 4, kind: output, shape index: {}]  }
   0x1   :  { %s20_s17 = sshll.u32 %s1108_s1, 4  ;;  %s21_s17 = int_to_ptr.vmem [resolvable:$true] %s20_s17 }
   0x2   :  { %11 = vsyncpa [#allocation6], 0  ;;  %s30_s20 = sshll.u32 %s1109_s2, 4  ;;  %s553_s21 = scalar_lea.vmem %s21_s17, 16  ;;  %s31_s20 = int_to_ptr.vmem [resolvable:$true] %s30_s20 }
   0x3   :  { %p554_p0 = scmp.ne.s32.totalorder %s21_s17, %s553_s21  ;;  %p558_p1 = scmp.lt.s32.totalorder %s21_s17, %s21_s17 }
   0x4   :  { %p559_p2 = scmp.lt.s32.totalorder %s553_s21, %s553_s21 }
   0x6   :  { %p560_p3 = por %p559_p2, %p558_p1 }
   0x8   :  { %p561_p4 = pnand %p560_p3, %p554_p0 }
   0xa   :  { %564 = shalt.err (!%p561_p4)
}
   0xb   :  { %s581_s22 = smov [#allocation3]   ;;  %s565_s23 = scalar_lea.vmem %s31_s20, 16 }
   0xc   :  { %23 = dma.vmem_to_smem %s21_s17, 16, %s581_s22, [#allocation4]  }
   0xd   :  { %p566_p5 = scmp.ne.s32.totalorder %s31_s20, %s565_s23  ;;  %p570_p6 = scmp.lt.s32.totalorder %s31_s20, %s31_s20 }
   0xe   :  { %p571_p7 = scmp.lt.s32.totalorder %s565_s23, %s565_s23 }
  0x10   :  { %p572_p8 = por %p571_p7, %p570_p6 }
  0x12   :  { %p573_p9 = pnand %p572_p8, %p566_p5 }
  0x14   :  { %576 = shalt.err (!%p573_p9)
}
  0x15   :  { %s582_s1 = smov [#allocation5]  }
  0x16   :  { %33 = dma.vmem_to_smem %s31_s20, 16, %s582_s1, [#allocation6]  }
  0x17   :  { %577 = dma.done.wait [#allocation4], 16  }
  0x18   :  { %578 = vsyncadd [#allocation4], 4294967280 }
  0x19   :  { %579 = dma.done.wait [#allocation6], 16  }
  0x1a   :  { %580 = vsyncadd [#allocation6], 4294967280 }
  0x1b   :  { %42 = sfence }
  0x1c   :  { %s43_s2 = sld [smem:[#allocation3]]  ;;  %s453_s24 = sld [smem:[#allocation3 + $0x1]]  ;;  %v625_v0 = vld [vmem:[%s1107_s0] sm:$0xff] }
  0x1d   :  { %s454_s25 = sld [smem:[#allocation3 + $0x2]]  ;;  %s455_s26 = sld [smem:[#allocation3 + $0x3]] }
  0x1e   :  { %s456_s27 = sld [smem:[#allocation3 + $0x4]]  ;;  %s457_s28 = sld [smem:[#allocation3 + $0x5]] }
  0x1f   :  { %s614_s29 = sld [smem:[#allocation3 + $0x6]]  ;;  %s616_s30 = sld [smem:[#allocation3 + $0x7]] }
  0x20   :  { %s618_s5 = sld [smem:[#allocation3 + $0x8]]  ;;  %s620_s6 = sld [smem:[#allocation3 + $0x9]] }
  0x21   :  { %s627_s9 = sld [smem:[#allocation3 + $0xa]]  ;;  %s629_s10 = sld [smem:[#allocation3 + $0xb]] }
  0x22   :  { %s631_s11 = sld [smem:[#allocation3 + $0xc]]  ;;  %s633_s12 = sld [smem:[#allocation3 + $0xd]]  ;;  %v145_v1 = vstv %s43_s2  ;;  %v150_v2 = vstv %s453_s24 }
  0x23   :  { %s635_s13 = sld [smem:[#allocation3 + $0xe]]  ;;  %s637_s14 = sld [smem:[#allocation3 + $0xf]]  ;;  %v640_v3 = vmul.f32 %v145_v1, %v625_v0  ;;  %v643_v4 = vmul.f32 %v150_v2, %v625_v0  ;;  %v155_v5 = vstv %s454_s25  ;;  %v161_v6 = vstv %s455_s26 }
  0x24   :  { %s645_s0 = sld [smem:[#allocation3 + $0x10]]  ;;  %s647_s15 = sld [smem:[#allocation3 + $0x11]]  ;;  %v650_v7 = vmul.f32 %v155_v5, %v625_v0  ;;  %v653_v8 = vmul.f32 %v161_v6, %v625_v0  ;;  %v167_v9 = vstv %s456_s27  ;;  %v173_v10 = vstv %s457_s28 }
  0x25   :  { %s655_s16 = sld [smem:[#allocation3 + $0x12]]  ;;  %s657_s17 = sld [smem:[#allocation3 + $0x13]]  ;;  %v660_v11 = vmul.f32 %v167_v9, %v625_v0  ;;  %v663_v12 = vmul.f32 %v173_v10, %v625_v0  ;;  %v179_v13 = vstv %s614_s29  ;;  %v185_v14 = vstv %s616_s30 }
  0x26   :  { %s667_s18 = sld [smem:[#allocation3 + $0x14]]  ;;  %s669_s19 = sld [smem:[#allocation3 + $0x15]]  ;;  %v672_v15 = vmul.f32 %v179_v13, %v625_v0  ;;  %v675_v16 = vmul.f32 %v185_v14, %v625_v0  ;;  %v191_v17 = vstv %s618_s5  ;;  %v197_v18 = vstv %s620_s6 }
  0x27   :  { %s679_s20 = sld [smem:[#allocation3 + $0x16]]  ;;  %s681_s21 = sld [smem:[#allocation3 + $0x17]]  ;;  %v684_v19 = vmul.f32 %v191_v17, %v625_v0  ;;  %v687_v20 = vmul.f32 %v197_v18, %v625_v0  ;;  %v203_v21 = vstv %s627_s9  ;;  %v209_v22 = vstv %s629_s10 }
  0x28   :  { %s691_s22 = sld [smem:[#allocation3 + $0x18]]  ;;  %s693_s23 = sld [smem:[#allocation3 + $0x19]]  ;;  %v696_v23 = vmul.f32 %v203_v21, %v625_v0  ;;  %v699_v24 = vmul.f32 %v209_v22, %v625_v0  ;;  %v215_v25 = vstv %s631_s11  ;;  %v221_v26 = vstv %s633_s12 }
  0x29   :  { %s703_s1 = sld [smem:[#allocation3 + $0x1a]]  ;;  %s705_s2 = sld [smem:[#allocation3 + $0x1b]]  ;;  %v708_v27 = vmul.f32 %v215_v25, %v625_v0  ;;  %v711_v28 = vmul.f32 %v221_v26, %v625_v0  ;;  %v227_v29 = vstv %s635_s13  ;;  %v233_v30 = vstv %s637_s14 }
  0x2a   :  { %s715_s24 = sld [smem:[#allocation3 + $0x1c]]  ;;  %s717_s25 = sld [smem:[#allocation3 + $0x1d]]  ;;  %v720_v31 = vmul.f32 %v227_v29, %v625_v0  ;;  %v723_v32 = vmul.f32 %v233_v30, %v625_v0  ;;  %v239_v33 = vstv %s645_s0  ;;  %v245_v34 = vstv %s647_s15 }
  0x2b   :  { %s727_s26 = sld [smem:[#allocation3 + $0x1e]]  ;;  %s729_s27 = sld [smem:[#allocation3 + $0x1f]]  ;;  %v732_v35 = vmul.f32 %v239_v33, %v625_v0  ;;  %v735_v36 = vmul.f32 %v245_v34, %v625_v0  ;;  %v251_v37 = vstv %s655_s16  ;;  %v257_v38 = vstv %s657_s17 }
  0x2c   :  { %s739_s28 = sld [smem:[#allocation3 + $0x20]]  ;;  %s741_s29 = sld [smem:[#allocation3 + $0x21]]  ;;  %v744_v39 = vmul.f32 %v251_v37, %v625_v0  ;;  %v747_v40 = vmul.f32 %v257_v38, %v625_v0  ;;  %v263_v41 = vstv %s667_s18  ;;  %v269_v42 = vstv %s669_s19 }
  0x2d   :  { %s751_s30 = sld [smem:[#allocation3 + $0x22]]  ;;  %s753_s5 = sld [smem:[#allocation3 + $0x23]]  ;;  %v756_v43 = vmul.f32 %v263_v41, %v625_v0  ;;  %v759_v44 = vmul.f32 %v269_v42, %v625_v0  ;;  %v275_v45 = vstv %s679_s20  ;;  %v281_v46 = vstv %s681_s21 }
  0x2e   :  { %s763_s6 = sld [smem:[#allocation3 + $0x24]]  ;;  %s765_s7 = sld [smem:[#allocation3 + $0x25]]  ;;  %v768_v47 = vmul.f32 %v275_v45, %v625_v0  ;;  %v771_v48 = vmul.f32 %v281_v46, %v625_v0  ;;  %v287_v49 = vstv %s691_s22  ;;  %v293_v50 = vstv %s693_s23 }
  0x2f   :  { %s775_s8 = sld [smem:[#allocation3 + $0x26]]  ;;  %s777_s9 = sld [smem:[#allocation3 + $0x27]]  ;;  %v780_v51 = vmul.f32 %v287_v49, %v625_v0  ;;  %v783_v52 = vmul.f32 %v293_v50, %v625_v0  ;;  %v299_v53 = vstv %s703_s1  ;;  %v305_v54 = vstv %s705_s2 }
  0x30   :  { %s787_s10 = sld [smem:[#allocation3 + $0x28]]  ;;  %s789_s11 = sld [smem:[#allocation3 + $0x29]]  ;;  %v792_v55 = vmul.f32 %v299_v53, %v625_v0  ;;  %v795_v56 = vmul.f32 %v305_v54, %v625_v0  ;;  %v311_v57 = vstv %s715_s24  ;;  %v317_v58 = vstv %s717_s25 }
  0x31   :  { %s799_s12 = sld [smem:[#allocation3 + $0x2a]]  ;;  %s801_s13 = sld [smem:[#allocation3 + $0x2b]]  ;;  %v804_v59 = vmul.f32 %v311_v57, %v625_v0  ;;  %v807_v60 = vmul.f32 %v317_v58, %v625_v0  ;;  %v323_v61 = vstv %s727_s26  ;;  %v329_v62 = vstv %s729_s27 }
  0x32   :  { %s811_s14 = sld [smem:[#allocation3 + $0x2c]]  ;;  %s813_s0 = sld [smem:[#allocation3 + $0x2d]]  ;;  %v816_v63 = vmul.f32 %v323_v61, %v625_v0  ;;  %v819_v1 = vmul.f32 %v329_v62, %v625_v0  ;;  %v335_v2 = vstv %s739_s28  ;;  %v341_v5 = vstv %s741_s29 }
  0x33   :  { %s823_s15 = sld [smem:[#allocation3 + $0x2e]]  ;;  %s825_s16 = sld [smem:[#allocation3 + $0x2f]]  ;;  %v828_v6 = vmul.f32 %v335_v2, %v625_v0  ;;  %v831_v9 = vmul.f32 %v341_v5, %v625_v0  ;;  %v347_v10 = vstv %s751_s30  ;;  %v353_v13 = vstv %s753_s5 }
  0x34   :  { %s835_s17 = sld [smem:[#allocation3 + $0x30]]  ;;  %s837_s18 = sld [smem:[#allocation3 + $0x31]]  ;;  %v840_v14 = vmul.f32 %v347_v10, %v625_v0  ;;  %v843_v17 = vmul.f32 %v353_v13, %v625_v0  ;;  %v359_v18 = vstv %s763_s6  ;;  %v365_v21 = vstv %s765_s7 }
  0x35   :  { %s847_s19 = sld [smem:[#allocation5]]  ;;  %s849_s20 = sld [smem:[#allocation5 + $0x1]]  ;;  %v852_v22 = vmul.f32 %v359_v18, %v625_v0  ;;  %v855_v25 = vmul.f32 %v365_v21, %v625_v0  ;;  %v371_v26 = vstv %s775_s8  ;;  %v377_v29 = vstv %s777_s9 }
  0x36   :  { %s859_s21 = sld [smem:[#allocation5 + $0x2]]  ;;  %s861_s22 = sld [smem:[#allocation5 + $0x3]]  ;;  %v864_v30 = vmul.f32 %v371_v26, %v625_v0  ;;  %v867_v33 = vmul.f32 %v377_v29, %v625_v0  ;;  %v383_v34 = vstv %s787_s10  ;;  %v389_v37 = vstv %s789_s11 }
  0x37   :  { %s871_s23 = sld [smem:[#allocation5 + $0x4]]  ;;  %s873_s1 = sld [smem:[#allocation5 + $0x5]]  ;;  %v876_v38 = vmul.f32 %v383_v34, %v625_v0  ;;  %v879_v41 = vmul.f32 %v389_v37, %v625_v0  ;;  %v395_v42 = vstv %s799_s12  ;;  %v401_v45 = vstv %s801_s13 }
  0x38   :  { %s883_s2 = sld [smem:[#allocation5 + $0x6]]  ;;  %s885_s24 = sld [smem:[#allocation5 + $0x7]]  ;;  %v888_v46 = vmul.f32 %v395_v42, %v625_v0  ;;  %v891_v49 = vmul.f32 %v401_v45, %v625_v0  ;;  %v407_v50 = vstv %s811_s14  ;;  %v413_v53 = vstv %s813_s0 }
  0x39   :  { %s895_s25 = sld [smem:[#allocation5 + $0x8]]  ;;  %s897_s26 = sld [smem:[#allocation5 + $0x9]]  ;;  %v900_v54 = vmul.f32 %v407_v50, %v625_v0  ;;  %v903_v57 = vmul.f32 %v413_v53, %v625_v0  ;;  %v419_v58 = vstv %s823_s15  ;;  %v425_v61 = vstv %s825_s16 }
  0x3a   :  { %v908_v62 = vmul.f32 %v419_v58, %v625_v0  ;;  %v911_v2 = vmul.f32 %v425_v61, %v625_v0  ;;  %v431_v5 = vstv %s835_s17  ;;  %v437_v10 = vstv %s837_s18  ;;  %s915_s27 = sld [smem:[#allocation5 + $0xa]]  ;;  %s917_s28 = sld [smem:[#allocation5 + $0xb]] }
  0x3b   :  { %v147_v13 = vstv %s847_s19  ;;  %v152_v18 = vstv %s849_s20  ;;  %v922_v21 = vmul.f32 %v431_v5, %v625_v0  ;;  %v925_v26 = vmul.f32 %v437_v10, %v625_v0  ;;  %s931_s29 = sld [smem:[#allocation5 + $0xc]]  ;;  %s933_s30 = sld [smem:[#allocation5 + $0xd]] }
  0x3c   :  { %v148_v29 = vadd.f32 %v147_v13, %v640_v3  ;;  %v153_v34 = vadd.f32 %v152_v18, %v643_v4  ;;  %v157_v37 = vstv %s859_s21  ;;  %v163_v42 = vstv %s861_s22  ;;  %s941_s5 = sld [smem:[#allocation5 + $0xe]]  ;;  %s943_s6 = sld [smem:[#allocation5 + $0xf]] }
  0x3d   :  { %v158_v45 = vadd.f32 %v157_v37, %v650_v7  ;;  %v164_v50 = vadd.f32 %v163_v42, %v653_v8  ;;  %v169_v53 = vstv %s871_s23  ;;  %v175_v58 = vstv %s873_s1  ;;  %s949_s7 = sld [smem:[#allocation5 + $0x10]]  ;;  %s951_s8 = sld [smem:[#allocation5 + $0x11]] }
  0x3e   :  { %v149_v0 = vmin.f32 %v148_v29, 0.0  ;;  %v154_v61 = vmax.f32 %v153_v34, 0.0  ;;  %v170_v3 = vadd.f32 %v169_v53, %v660_v11  ;;  %v176_v4 = vadd.f32 %v175_v58, %v663_v12  ;;  %s957_s9 = sld [smem:[#allocation5 + $0x12]]  ;;  %s959_s10 = sld [smem:[#allocation5 + $0x13]] }
  0x3f   :  { %v159_v5 = vmin.f32 %v158_v45, 0.0  ;;  %v165_v10 = vmin.f32 %v164_v50, 0.0  ;;  %v181_v13 = vstv %s883_s2  ;;  %v187_v7 = vstv %s885_s24  ;;  %s965_s11 = sld [smem:[#allocation5 + $0x14]]  ;;  %s967_s12 = sld [smem:[#allocation5 + $0x15]] }
  0x40   :  { %v171_v18 = vmax.f32 %v170_v3, 0.0  ;;  %v177_v8 = vmax.f32 %v176_v4, 0.0  ;;  %v182_v37 = vadd.f32 %v181_v13, %v672_v15  ;;  %v188_v29 = vadd.f32 %v187_v7, %v675_v16  ;;  %s973_s13 = sld [smem:[#allocation5 + $0x16]]  ;;  %s975_s14 = sld [smem:[#allocation5 + $0x17]] }
  0x41   :  { %v160_v11 = vadd.f32 %v159_v5, %v149_v0  ;;  %v166_v12 = vadd.f32 %v165_v10, %v154_v61  ;;  %v193_v34 = vstv %s895_s25  ;;  %v199_v42 = vstv %s897_s26  ;;  %s981_s0 = sld [smem:[#allocation5 + $0x18]]  ;;  %s983_s15 = sld [smem:[#allocation5 + $0x19]] }
  0x42   :  { %v183_v45 = vmax.f32 %v182_v37, 0.0  ;;  %v189_v50 = vmax.f32 %v188_v29, 0.0  ;;  %v194_v53 = vadd.f32 %v193_v34, %v684_v19  ;;  %v200_v58 = vadd.f32 %v199_v42, %v687_v20  ;;  %s989_s16 = sld [smem:[#allocation5 + $0x1a]]  ;;  %s991_s17 = sld [smem:[#allocation5 + $0x1b]] }
  0x43   :  { %v172_v15 = vadd.f32 %v171_v18, %v160_v11  ;;  %v178_v16 = vadd.f32 %v177_v8, %v166_v12  ;;  %v205_v3 = vstv %s915_s27  ;;  %v211_v4 = vstv %s917_s28  ;;  %s997_s18 = sld [smem:[#allocation5 + $0x1c]]  ;;  %s999_s19 = sld [smem:[#allocation5 + $0x1d]] }
  0x44   :  { %v195_v0 = vmin.f32 %v194_v53, 0.0  ;;  %v201_v61 = vmax.f32 %v200_v58, 0.0  ;;  %v206_v5 = vadd.f32 %v205_v3, %v696_v23  ;;  %v212_v10 = vadd.f32 %v211_v4, %v699_v24  ;;  %s1005_s20 = sld [smem:[#allocation5 + $0x1e]]  ;;  %s1007_s21 = sld [smem:[#allocation5 + $0x1f]] }
  0x45   :  { %v184_v19 = vadd.f32 %v183_v45, %v172_v15  ;;  %v190_v20 = vadd.f32 %v189_v50, %v178_v16  ;;  %v217_v13 = vstv %s931_s29  ;;  %v223_v7 = vstv %s933_s30  ;;  %s1013_s22 = sld [smem:[#allocation5 + $0x20]]  ;;  %s1015_s23 = sld [smem:[#allocation5 + $0x21]] }
  0x46   :  { %v207_v18 = vmin.f32 %v206_v5, 0.0  ;;  %v213_v8 = vmax.f32 %v212_v10, 0.0  ;;  %v218_v37 = vadd.f32 %v217_v13, %v708_v27  ;;  %v224_v29 = vadd.f32 %v223_v7, %v711_v28  ;;  %s1021_s1 = sld [smem:[#allocation5 + $0x22]]  ;;  %s1023_s2 = sld [smem:[#allocation5 + $0x23]] }
  0x47   :  { %v196_v23 = vadd.f32 %v195_v0, %v184_v19  ;;  %v202_v24 = vadd.f32 %v201_v61, %v190_v20  ;;  %v229_v11 = vstv %s941_s5  ;;  %v235_v12 = vstv %s943_s6  ;;  %s1029_s24 = sld [smem:[#allocation5 + $0x24]]  ;;  %s1031_s25 = sld [smem:[#allocation5 + $0x25]] }
  0x48   :  { %v219_v34 = vmax.f32 %v218_v37, 0.0  ;;  %v225_v42 = vmax.f32 %v224_v29, 0.0  ;;  %v230_v45 = vadd.f32 %v229_v11, %v720_v31  ;;  %v236_v50 = vadd.f32 %v235_v12, %v723_v32  ;;  %s1037_s26 = sld [smem:[#allocation5 + $0x26]]  ;;  %s1039_s27 = sld [smem:[#allocation5 + $0x27]] }
  0x49   :  { %v208_v27 = vadd.f32 %v207_v18, %v196_v23  ;;  %v214_v28 = vadd.f32 %v213_v8, %v202_v24  ;;  %v241_v53 = vstv %s949_s7  ;;  %v247_v58 = vstv %s951_s8  ;;  %s1045_s28 = sld [smem:[#allocation5 + $0x28]]  ;;  %s1047_s29 = sld [smem:[#allocation5 + $0x29]] }
  0x4a   :  { %v231_v15 = vmin.f32 %v230_v45, 0.0  ;;  %v237_v16 = vmax.f32 %v236_v50, 0.0  ;;  %v242_v3 = vadd.f32 %v241_v53, %v732_v35  ;;  %v248_v4 = vadd.f32 %v247_v58, %v735_v36  ;;  %s1053_s30 = sld [smem:[#allocation5 + $0x2a]]  ;;  %s1055_s5 = sld [smem:[#allocation5 + $0x2b]] }
  0x4b   :  { %v220_v31 = vadd.f32 %v219_v34, %v208_v27  ;;  %v226_v32 = vadd.f32 %v225_v42, %v214_v28  ;;  %v253_v0 = vstv %s957_s9  ;;  %v259_v61 = vstv %s959_s10  ;;  %s1061_s6 = sld [smem:[#allocation5 + $0x2c]]  ;;  %s1063_s7 = sld [smem:[#allocation5 + $0x2d]] }
  0x4c   :  { %v243_v5 = vmin.f32 %v242_v3, 0.0  ;;  %v249_v10 = vmax.f32 %v248_v4, 0.0  ;;  %v254_v19 = vadd.f32 %v253_v0, %v744_v39  ;;  %v260_v20 = vadd.f32 %v259_v61, %v747_v40  ;;  %s1069_s8 = sld [smem:[#allocation5 + $0x2e]]  ;;  %s1071_s9 = sld [smem:[#allocation5 + $0x2f]] }
  0x4d   :  { %v232_v35 = vadd.f32 %v231_v15, %v220_v31  ;;  %v238_v36 = vadd.f32 %v237_v16, %v226_v32  ;;  %v265_v13 = vstv %s965_s11  ;;  %v271_v7 = vstv %s967_s12  ;;  %s1077_s10 = sld [smem:[#allocation5 + $0x30]]  ;;  %s1079_s11 = sld [smem:[#allocation5 + $0x31]] }
  0x4e   :  { %v255_v18 = vmin.f32 %v254_v19, 0.0  ;;  %v261_v8 = vmin.f32 %v260_v20, 0.0  ;;  %v266_v37 = vadd.f32 %v265_v13, %v756_v43  ;;  %v272_v29 = vadd.f32 %v271_v7, %v759_v44 }
  0x4f   :  { %v244_v39 = vadd.f32 %v243_v5, %v232_v35  ;;  %v250_v40 = vadd.f32 %v249_v10, %v238_v36  ;;  %v277_v23 = vstv %s973_s13  ;;  %v283_v24 = vstv %s975_s14 }
  0x50   :  { %v267_v11 = vmin.f32 %v266_v37, 0.0  ;;  %v273_v12 = vmax.f32 %v272_v29, 0.0  ;;  %v278_v34 = vadd.f32 %v277_v23, %v768_v47  ;;  %v284_v42 = vadd.f32 %v283_v24, %v771_v48 }
  0x51   :  { %v256_v43 = vadd.f32 %v255_v18, %v244_v39  ;;  %v262_v44 = vadd.f32 %v261_v8, %v250_v40  ;;  %v289_v45 = vstv %s981_s0  ;;  %v295_v50 = vstv %s983_s15 }
  0x52   :  { %v279_v27 = vmin.f32 %v278_v34, 0.0  ;;  %v285_v28 = vmax.f32 %v284_v42, 0.0  ;;  %v290_v53 = vadd.f32 %v289_v45, %v780_v51  ;;  %v296_v58 = vadd.f32 %v295_v50, %v783_v52 }
  0x53   :  { %v268_v47 = vadd.f32 %v267_v11, %v256_v43  ;;  %v274_v48 = vadd.f32 %v273_v12, %v262_v44  ;;  %v301_v15 = vstv %s989_s16  ;;  %v307_v16 = vstv %s991_s17 }
  0x54   :  { %v291_v3 = vmin.f32 %v290_v53, 0.0  ;;  %v297_v4 = vmax.f32 %v296_v58, 0.0  ;;  %v302_v31 = vadd.f32 %v301_v15, %v792_v55  ;;  %v308_v32 = vadd.f32 %v307_v16, %v795_v56 }
  0x55   :  { %v280_v51 = vadd.f32 %v279_v27, %v268_v47  ;;  %v286_v52 = vadd.f32 %v285_v28, %v274_v48  ;;  %v313_v0 = vstv %s997_s18  ;;  %v319_v61 = vstv %s999_s19 }
  0x56   :  { %v303_v5 = vmax.f32 %v302_v31, 0.0  ;;  %v309_v10 = vmax.f32 %v308_v32, 0.0  ;;  %v314_v19 = vadd.f32 %v313_v0, %v804_v59  ;;  %v320_v20 = vadd.f32 %v319_v61, %v807_v60 }
  0x57   :  { %v292_v55 = vadd.f32 %v291_v3, %v280_v51  ;;  %v298_v56 = vadd.f32 %v297_v4, %v286_v52  ;;  %v325_v35 = vstv %s1005_s20  ;;  %v331_v36 = vstv %s1007_s21 }
  0x58   :  { %v315_v13 = vmax.f32 %v314_v19, 0.0  ;;  %v321_v7 = vmin.f32 %v320_v20, 0.0  ;;  %v326_v18 = vadd.f32 %v325_v35, %v816_v63  ;;  %v332_v8 = vadd.f32 %v331_v36, %v819_v1 }
  0x59   :  { %v304_v59 = vadd.f32 %v303_v5, %v292_v55  ;;  %v310_v60 = vadd.f32 %v309_v10, %v298_v56  ;;  %v337_v37 = vstv %s1013_s22  ;;  %v343_v29 = vstv %s1015_s23 }
  0x5a   :  { %v327_v39 = vmax.f32 %v326_v18, 0.0  ;;  %v333_v40 = vmin.f32 %v332_v8, 0.0  ;;  %v338_v23 = vadd.f32 %v337_v37, %v828_v6  ;;  %v344_v24 = vadd.f32 %v343_v29, %v831_v9 }
  0x5b   :  { %v316_v63 = vadd.f32 %v315_v13, %v304_v59  ;;  %v322_v1 = vadd.f32 %v321_v7, %v310_v60  ;;  %v349_v11 = vstv %s1021_s1  ;;  %v355_v12 = vstv %s1023_s2 }
  0x5c   :  { %v339_v34 = vmin.f32 %v338_v23, 0.0  ;;  %v345_v42 = vmin.f32 %v344_v24, 0.0  ;;  %v350_v43 = vadd.f32 %v349_v11, %v840_v14  ;;  %v356_v44 = vadd.f32 %v355_v12, %v843_v17 }
  0x5d   :  { %v328_v6 = vadd.f32 %v327_v39, %v316_v63  ;;  %v334_v9 = vadd.f32 %v333_v40, %v322_v1  ;;  %v361_v45 = vstv %s1029_s24  ;;  %v367_v50 = vstv %s1031_s25 }
  0x5e   :  { %v351_v27 = vmin.f32 %v350_v43, 0.0  ;;  %v357_v28 = vmin.f32 %v356_v44, 0.0  ;;  %v362_v53 = vadd.f32 %v361_v45, %v852_v22  ;;  %v368_v58 = vadd.f32 %v367_v50, %v855_v25 }
  0x5f   :  { %v340_v14 = vadd.f32 %v339_v34, %v328_v6  ;;  %v346_v17 = vadd.f32 %v345_v42, %v334_v9  ;;  %v373_v47 = vstv %s1037_s26  ;;  %v379_v48 = vstv %s1039_s27 }
  0x60   :  { %v363_v15 = vmin.f32 %v362_v53, 0.0  ;;  %v369_v16 = vmax.f32 %v368_v58, 0.0  ;;  %v374_v3 = vadd.f32 %v373_v47, %v864_v30  ;;  %v380_v22 = vadd.f32 %v379_v48, %v867_v33 }
  0x61   :  { %v352_v25 = vadd.f32 %v351_v27, %v340_v14  ;;  %v358_v4 = vadd.f32 %v357_v28, %v346_v17  ;;  %v385_v31 = vstv %s1045_s28  ;;  %v391_v32 = vstv %s1047_s29 }
  0x62   :  { %v375_v51 = vmin.f32 %v374_v3, 0.0  ;;  %v381_v52 = vmax.f32 %v380_v22, 0.0  ;;  %v386_v0 = vadd.f32 %v385_v31, %v876_v38  ;;  %v392_v61 = vadd.f32 %v391_v32, %v879_v41 }
  0x63   :  { %v364_v5 = vadd.f32 %v363_v15, %v352_v25  ;;  %v370_v30 = vadd.f32 %v369_v16, %v358_v4  ;;  %v397_v10 = vstv %s1053_s30  ;;  %v403_v33 = vstv %s1055_s5 }
  0x64   :  { %v387_v19 = vmin.f32 %v386_v0, 0.0  ;;  %v393_v20 = vmin.f32 %v392_v61, 0.0  ;;  %v398_v55 = vadd.f32 %v397_v10, %v888_v46  ;;  %v404_v56 = vadd.f32 %v403_v33, %v891_v49 }
  0x65   :  { %v376_v35 = vadd.f32 %v375_v51, %v364_v5  ;;  %v382_v36 = vadd.f32 %v381_v52, %v370_v30  ;;  %v409_v13 = vstv %s1061_s6  ;;  %v415_v7 = vstv %s1063_s7 }
  0x66   :  { %v399_v38 = vmax.f32 %v398_v55, 0.0  ;;  %v405_v41 = vmax.f32 %v404_v56, 0.0  ;;  %v410_v18 = vadd.f32 %v409_v13, %v900_v54  ;;  %v416_v8 = vadd.f32 %v415_v7, %v903_v57 }
  0x67   :  { %v388_v59 = vadd.f32 %v387_v19, %v376_v35  ;;  %v394_v60 = vadd.f32 %v393_v20, %v382_v36  ;;  %v421_v37 = vstv %s1069_s8  ;;  %v427_v29 = vstv %s1071_s9 }
  0x68   :  { %v411_v39 = vmax.f32 %v410_v18, 0.0  ;;  %v417_v46 = vmin.f32 %v416_v8, 0.0  ;;  %v422_v49 = vadd.f32 %v421_v37, %v908_v62  ;;  %v428_v40 = vadd.f32 %v427_v29, %v911_v2 }
  0x69   :  { %v400_v23 = vadd.f32 %v399_v38, %v388_v59  ;;  %v406_v24 = vadd.f32 %v405_v41, %v394_v60  ;;  %v433_v63 = vstv %s1077_s10  ;;  %v439_v1 = vstv %s1079_s11 }
  0x6a   :  { %v423_v11 = vmin.f32 %v422_v49, 0.0  ;;  %v429_v12 = vmin.f32 %v428_v40, 0.0  ;;  %v434_v54 = vadd.f32 %v433_v63, %v922_v21  ;;  %v440_v57 = vadd.f32 %v439_v1, %v925_v26 }
  0x6b   :  { %v412_v34 = vadd.f32 %v411_v39, %v400_v23  ;;  %v418_v42 = vadd.f32 %v417_v46, %v406_v24  ;;  %v443_v62 = vstv %s1110_s3 }
  0x6c   :  { %v435_v43 = vmin.f32 %v434_v54, 0.0  ;;  %v441_v44 = vmin.f32 %v440_v57, 0.0 }
  0x6d   :  { %v424_v6 = vadd.f32 %v423_v11, %v412_v34  ;;  %v430_v9 = vadd.f32 %v429_v12, %v418_v42 }
  0x6f   :  { %v436_v2 = vadd.f32 %v435_v43, %v424_v6  ;;  %v442_v45 = vadd.f32 %v441_v44, %v430_v9 }
  0x71   :  { %v444_v50 = vadd.f32 %v443_v62, %v442_v45 }
  0x73   :  { %v445_v27 = vadd.f32 %v444_v50, %v436_v2 }
  0x75   :  { %446 = vst [vmem:[%s1111_s4] sm:$0xff] %v445_v27 }
  0x76   :  { %451 = vsyncpa [#allocation4], 1 }
  0x77   :  { %452 = vsyncpa [#allocation6], 1 }

</bundles_post_ra>
